<compile_context>
chip_gen: v7x
topology: tpu7x:2x2x1
jax: 0.10.0
libtpu: 0.0.40
codegen_flags: <defaults>
</compile_context>

<pallas_src>
import functools

import jax
import jax.numpy as jnp
from jax.experimental import pallas as pl
from jax.experimental.pallas import tpu as pltpu

_LANES = 128
_SUBLANES = 8
_TARGET_BLOCK_ROWS = 1024  # 1024 x 128 f32 = 512 KiB per block per input


def _sse_kernel(a_ref, b_ref, o_ref, *, block_rows, rows_valid, blocks_per_core, need_mask):
    """Accumulate a (1, 8, 128) partial sum of (a - b)^2 into the resident output block."""

    @pl.when(pl.program_id(1) == 0)
    def _init():
        o_ref[...] = jnp.zeros_like(o_ref)

    a = a_ref[...].astype(jnp.float32)
    b = b_ref[...].astype(jnp.float32)
    d = a - b
    sq = d * d

    if need_mask:
        # Mask rows beyond the valid slab (partial last block, or a fully out-of-range
        # block index that the index_map clamped to the last valid block).
        rb = pl.program_id(0) * blocks_per_core + pl.program_id(1)
        row0 = rb * block_rows
        row_ids = row0 + jax.lax.broadcasted_iota(jnp.int32, (block_rows, _LANES), 0)
        sq = jnp.where(row_ids < rows_valid, sq, 0.0)

    # Fold (block_rows, 128) -> (1, 8, 128) with pure elementwise (VPU) adds; no XLU,
    # no scalar dependency in the inner loop.
    partial = jnp.sum(
        sq.reshape(block_rows // _SUBLANES, _SUBLANES, _LANES), axis=0, keepdims=True
    )
    o_ref[...] += partial


def commit_loss(feats: jax.Array, quantized_feats: jax.Array) -> jax.Array:
    """MSE loss (mean reduction over all elements), hot path computed in a Pallas kernel."""
    assert feats.shape == quantized_feats.shape, "MSELoss requires matching shapes"
    n_elems = feats.size
    out_dtype = jnp.result_type(feats.dtype, quantized_feats.dtype)

    a_flat = feats.reshape(-1)
    b_flat = quantized_feats.reshape(-1)

    chunk = _SUBLANES * _LANES  # 1024 elements = one (8, 128) vreg worth per input
    n_main = (n_elems // chunk) * chunk

    sse = jnp.zeros((), jnp.float32)

    if n_main > 0:
        rows = n_main // _LANES                      # multiple of 8 by construction
        block_rows = min(_TARGET_BLOCK_ROWS, rows)   # multiple of 8 (or full dim)
        total_row_blocks = pl.cdiv(rows, block_rows)
        n_split = 2 if total_row_blocks >= 2 else 1  # 2-way "parallel" split for 2-TC chips
        blocks_per_core = pl.cdiv(total_row_blocks, n_split)
        need_mask = (rows % block_rows != 0) or (n_split * blocks_per_core != total_row_blocks)

        if n_main == n_elems:
            a2 = a_flat.reshape(rows, _LANES)        # pure reshape, no HBM copy
            b2 = b_flat.reshape(rows, _LANES)
        else:
            a2 = a_flat[:n_main].reshape(rows, _LANES)
            b2 = b_flat[:n_main].reshape(rows, _LANES)

        def in_index_map(p, i):
            # Clamp so an out-of-range block index (odd block count split across 2 cores)
            # re-reads the last valid block; its contribution is masked to zero in-kernel.
            rb = jnp.minimum(p * blocks_per_core + i, total_row_blocks - 1)
            return (rb, 0)

        kernel = functools.partial(
            _sse_kernel,
            block_rows=block_rows,
            rows_valid=rows,
            blocks_per_core=blocks_per_core,
            need_mask=need_mask,
        )

        partials = pl.pallas_call(
            kernel,
            out_shape=jax.ShapeDtypeStruct((n_split, _SUBLANES, _LANES), jnp.float32),
            grid_spec=pltpu.PrefetchScalarGridSpec(
                num_scalar_prefetch=0,
                grid=(n_split, blocks_per_core),
                in_specs=[
                    pl.BlockSpec((block_rows, _LANES), in_index_map),
                    pl.BlockSpec((block_rows, _LANES), in_index_map),
                ],
                out_specs=pl.BlockSpec((1, _SUBLANES, _LANES), lambda p, i: (p, 0, 0)),
            ),
            compiler_params=pltpu.CompilerParams(
                dimension_semantics=("parallel", "arbitrary"),
            ),
        )(a2, b2)

        # Final cross-lane reduce of the tiny (n_split, 8, 128) partial slab in plain JAX.
        sse = sse + jnp.sum(partials, dtype=jnp.float32)

    if n_main < n_elems:
        # Tail of < 1024 elements: trivial to handle in plain JAX; avoids padding/copying
        # the full tensors just to make them divisible.
        ta = a_flat[n_main:].astype(jnp.float32)
        tb = b_flat[n_main:].astype(jnp.float32)
        sse = sse + jnp.sum((ta - tb) ** 2)

    mean = sse / jnp.float32(n_elems)
    # torch MSELoss returns a 0-d tensor in the (promoted) input dtype.
    # Note: accumulation is always f32, so bf16 inputs get a more accurate (not bit-exact
    # vs torch-bf16) result.
    return mean.astype(out_dtype)


if __name__ == "__main__":
    key = jax.random.PRNGKey(0)
    k1, k2 = jax.random.split(key)

    # Small NCHW-shaped example consistent with typical commit-loss usage.
    feats = jax.random.normal(k1, (2, 4, 16, 16), dtype=jnp.float32)
    quantized_feats = jax.random.normal(k2, (2, 4, 16, 16), dtype=jnp.float32)

    loss = commit_loss(feats, quantized_feats)
    jax.block_until_ready(loss)

    # Reference check against plain JAX (== torch.nn.MSELoss semantics).
    ref = jnp.mean((feats - quantized_feats) ** 2)
    assert jnp.allclose(loss, ref, rtol=1e-5, atol=1e-6), (loss, ref)

    print("KERNEL_OK")
</pallas_src>

<mosaic_0001>
module attributes {stable_mosaic.version = 11 : i64} {
  func.func @_sse_kernel(%arg0: i32, %arg1: i32, %arg2: memref<16x128xf32, #tpu.memory_space<vmem>>, %arg3: memref<16x128xf32, #tpu.memory_space<vmem>>, %arg4: memref<1x8x128xf32, #tpu.memory_space<vmem>>) attributes {dimension_semantics = [#tpu.dimension_semantics<parallel>, #tpu.dimension_semantics<arbitrary>], iteration_bounds = array<i64: 1, 1>, scalar_prefetch = 0 : i64, scratch_operands = 0 : i64, tpu.core_type = #tpu.core_type<tc>, window_params = [{transform_indices = @transform_0, window_bounds = array<i64: 16, 128>}, {transform_indices = @transform_1, window_bounds = array<i64: 16, 128>}, {transform_indices = @transform_2, window_bounds = array<i64: 1, 8, 128>}]} {
    %c0_i32 = arith.constant 0 : i32
    %0 = arith.cmpi eq, %arg1, %c0_i32 : i32
    %1 = arith.extui %0 : i1 to i32
    %c0_i32_0 = arith.constant 0 : i32
    %2 = arith.cmpi ne, %1, %c0_i32_0 : i32
    scf.if %2 {
      %cst_10 = arith.constant 0.000000e+00 : f32
      %13 = vector.broadcast %cst_10 : f32 to vector<1x8x128xf32>
      %c0_11 = arith.constant 0 : index
      %c0_12 = arith.constant 0 : index
      %c0_13 = arith.constant 0 : index
      %14 = vector.load %arg4[%c0_11, %c0_12, %c0_13] : memref<1x8x128xf32, #tpu.memory_space<vmem>>, vector<1x8x128xf32>
      tpu.vector_store %arg4[%c0_11, %c0_12, %c0_13], %13 {strides = array<i32>} : memref<1x8x128xf32, #tpu.memory_space<vmem>>, vector<1x8x128xf32>,
    } else {
    }
    %c0 = arith.constant 0 : index
    %c0_1 = arith.constant 0 : index
    %3 = vector.load %arg2[%c0, %c0_1] : memref<16x128xf32, #tpu.memory_space<vmem>>, vector<16x128xf32>
    %c0_2 = arith.constant 0 : index
    %c0_3 = arith.constant 0 : index
    %4 = vector.load %arg3[%c0_2, %c0_3] : memref<16x128xf32, #tpu.memory_space<vmem>>, vector<16x128xf32>
    %5 = arith.subf %3, %4 : vector<16x128xf32>
    %6 = arith.mulf %5, %5 : vector<16x128xf32>
    %7 = vector.shape_cast %6 : vector<16x128xf32> to vector<2x8x128xf32>
    %cst = arith.constant dense<0.000000e+00> : vector<8x128xf32>
    %8 = vector.multi_reduction <add>, %7, %cst [0] : vector<2x8x128xf32> to vector<8x128xf32>
    %9 = vector.shape_cast %8 : vector<8x128xf32> to vector<1x8x128xf32>
    %c0_4 = arith.constant 0 : index
    %c0_5 = arith.constant 0 : index
    %c0_6 = arith.constant 0 : index
    %10 = vector.load %arg4[%c0_4, %c0_5, %c0_6] : memref<1x8x128xf32, #tpu.memory_space<vmem>>, vector<1x8x128xf32>
    %11 = arith.addf %10, %9 : vector<1x8x128xf32>
    %c0_7 = arith.constant 0 : index
    %c0_8 = arith.constant 0 : index
    %c0_9 = arith.constant 0 : index
    %12 = vector.load %arg4[%c0_7, %c0_8, %c0_9] : memref<1x8x128xf32, #tpu.memory_space<vmem>>, vector<1x8x128xf32>
    tpu.vector_store %arg4[%c0_7, %c0_8, %c0_9], %11 {strides = array<i32>} : memref<1x8x128xf32, #tpu.memory_space<vmem>>, vector<1x8x128xf32>,
    return
  }
  func.func @transform_0(%arg0: i32, %arg1: i32) -> (i32, i32) {
    %c1_i32 = arith.constant 1 : i32
    %0 = arith.muli %arg0, %c1_i32 : i32
    %1 = arith.addi %0, %arg1 : i32
    %c0_i32 = arith.constant 0 : i32
    %2 = arith.minsi %1, %c0_i32 : i32
    %c0_i32_0 = arith.constant 0 : i32
    %c0_i32_1 = arith.constant 0 : i32
    return %2, %c0_i32_0 : i32, i32
  }
  func.func @transform_1(%arg0: i32, %arg1: i32) -> (i32, i32) {
    %c1_i32 = arith.constant 1 : i32
    %0 = arith.muli %arg0, %c1_i32 : i32
    %1 = arith.addi %0, %arg1 : i32
    %c0_i32 = arith.constant 0 : i32
    %2 = arith.minsi %1, %c0_i32 : i32
    %c0_i32_0 = arith.constant 0 : i32
    %c0_i32_1 = arith.constant 0 : i32
    return %2, %c0_i32_0 : i32, i32
  }
  func.func @transform_2(%arg0: i32, %arg1: i32) -> (i32, i32, i32) {
    %c0_i32 = arith.constant 0 : i32
    %c0_i32_0 = arith.constant 0 : i32
    %c0_i32_1 = arith.constant 0 : i32
    return %arg0, %c0_i32, %c0_i32_0 : i32, i32, i32
  }
}

</mosaic_0001>

<bundles_post_ra>
// kernel: tpu_custom_call.1
= control target key start
LH: loop header
LB: loop body
LE: loop exit
PB: predicated region body
PF: predicated region fallthrough
CT: control target
= control target key end

     0   :  { %7 = vsyncpa [#allocation3], 0  ;;  %s231_s0 = inlined_call_operand.hbm [shape: f32[16,128], index: 0, kind: input, shape index: {}]   ;;  %s232_s1 = inlined_call_operand.hbm [shape: f32[16,128], index: 1, kind: input, shape index: {}]   ;;  %s233_s2 = inlined_call_operand.hbm [shape: f32[1,8,128], index: 2, kind: output, shape index: {}]  }
   0x1   :  { %8 = vsyncpa [#allocation6], 0 }
   0x2   :  { %9 = vsyncpa [#allocation4], 0  ;;  %s175_s9 = smov [#allocation2]   ;;  %s103_s13 = scalar_lea.hbm %s231_s0, 256 }
   0x3   :  { %s21_s10 = sshll.u32 %s175_s9, 4  ;;  %p104_p0 = scmp.ne.s32.totalorder %s231_s0, %s103_s13  ;;  %s22_s10 = int_to_ptr.vmem [resolvable:$true] %s21_s10 }
   0x4   :  { %p107_p1 = scmp.lt.u32.totalorder %s103_s13, %s231_s0 }
   0x6   :  { %p109_p2 = pnand %p107_p1, %p104_p0 }
   0x8   :  { %112 = shalt.err (!%p109_p2)
}
   0x9   :  { %s113_s18 = scalar_lea.vmem %s22_s10, 256  ;;  %p118_p4 = scmp.lt.s32.totalorder %s22_s10, %s22_s10 }
   0xa   :  { %p114_p3 = scmp.ne.s32.totalorder %s22_s10, %s113_s18  ;;  %p119_p5 = scmp.lt.s32.totalorder %s113_s18, %s113_s18 }
   0xc   :  { %p120_p6 = por %p119_p5, %p118_p4 }
   0xe   :  { %p121_p7 = pnand %p120_p6, %p114_p3 }
  0x10   :  { %124 = shalt.err (!%p121_p7)
}
  0x11   :  { %s176_s19 = smov 128   ;;  %s177_s20 = smov 8  }
  0x12   :  { %27 = dma.hbm_to_vmem [thread:$0]  %s231_s0, 256, %s22_s10, [#allocation3], %s176_s19, %s176_s19, %s177_s20  }
  0x13   :  { %s178_s23 = smov [#allocation5]   ;;  %s125_s27 = scalar_lea.hbm %s232_s1, 256 }
  0x14   :  { %s39_s24 = sshll.u32 %s178_s23, 4  ;;  %p126_p8 = scmp.ne.s32.totalorder %s232_s1, %s125_s27  ;;  %s40_s24 = int_to_ptr.vmem [resolvable:$true] %s39_s24 }
  0x15   :  { %p129_p9 = scmp.lt.u32.totalorder %s125_s27, %s232_s1 }
  0x17   :  { %p131_p10 = pnand %p129_p9, %p126_p8 }
  0x19   :  { %134 = shalt.err (!%p131_p10)
}
  0x1a   :  { %s135_s4 = scalar_lea.vmem %s40_s24, 256  ;;  %p140_p12 = scmp.lt.s32.totalorder %s40_s24, %s40_s24 }
  0x1b   :  { %p136_p11 = scmp.ne.s32.totalorder %s40_s24, %s135_s4  ;;  %p141_p13 = scmp.lt.s32.totalorder %s135_s4, %s135_s4 }
  0x1d   :  { %p142_p0 = por %p141_p13, %p140_p12 }
  0x1f   :  { %p143_p1 = pnand %p142_p0, %p136_p11 }
  0x21   :  { %146 = shalt.err (!%p143_p1)
}
  0x22   :  { %45 = dma.hbm_to_vmem [thread:$0]  %s232_s1, 256, %s40_s24, [#allocation6], %s176_s19, %s176_s19, %s177_s20  }
  0x23   :  { %169 = dma.done.wait [#allocation3], 256  }
  0x24   :  { %170 = vsyncadd [#allocation3], 4294967040 }
  0x25   :  { %171 = dma.done.wait [#allocation6], 256  }
  0x26   :  { %172 = vsyncadd [#allocation6], 4294967040  ;;  %v65_v0 = vld [vmem:[#allocation2] sm:$0xff]  ;;  %v66_v1 = vld [vmem:[#allocation2 + $0x8] sm:$0xff]  ;;  %s179_s6 = smov [#allocation7]  }
  0x27   :  { %v67_v2 = vld [vmem:[#allocation5] sm:$0xff]  ;;  %v68_v3 = vld [vmem:[#allocation5 + $0x8] sm:$0xff]  ;;  %s83_s7 = sshll.u32 %s179_s6, 4  ;;  %s84_s7 = int_to_ptr.vmem [resolvable:$true] %s83_s7 }
  0x28   :  { %v69_v4 = vsub.f32 %v65_v0, %v67_v2  ;;  %v70_v5 = vsub.f32 %v66_v1, %v68_v3  ;;  %s147_s8 = scalar_lea.vmem %s84_s7, 128  ;;  %p152_p3 = scmp.lt.s32.totalorder %s84_s7, %s84_s7 }
  0x29   :  { %p148_p2 = scmp.ne.s32.totalorder %s84_s7, %s147_s8  ;;  %p153_p4 = scmp.lt.s32.totalorder %s147_s8, %s147_s8 }
  0x2a   :  { %v71_v6 = vmul.f32 %v69_v4, %v69_v4  ;;  %v72_v7 = vmul.f32 %v70_v5, %v70_v5 }
  0x2b   :  { %p154_p5 = por %p153_p4, %p152_p3 }
  0x2c   :  { %v73_v8 = vadd.f32 %v72_v7, %v71_v6 }
  0x2d   :  { %p155_p6 = pnand %p154_p5, %p148_p2 }
  0x2e   :  { %76 = vst [vmem:[#allocation7] sm:$0xff] %v73_v8 }
  0x2f   :  { %158 = shalt.err (!%p155_p6)
}
  0x30   :  { %s159_s10 = scalar_lea.hbm %s233_s2, 128 }
  0x31   :  { %p160_p7 = scmp.ne.s32.totalorder %s233_s2, %s159_s10  ;;  %p163_p8 = scmp.lt.u32.totalorder %s159_s10, %s233_s2 }
  0x33   :  { %p165_p9 = pnand %p163_p8, %p160_p7 }
  0x35   :  { %168 = shalt.err (!%p165_p9)
}
  0x36   :  { %86 = dma.vmem_to_hbm [thread:$0]  %s84_s7, 128, %s233_s2, [#allocation4]  }
  0x37   :  { %173 = dma.done.wait [#allocation4], 128  }
  0x38   :  { %174 = vsyncadd [#allocation4], 4294967168 }
  0x39   :  { %90 = vsyncpa [#allocation3], 1 }
  0x3a   :  { %91 = vsyncpa [#allocation6], 1 }
  0x3b   :  { %92 = vsyncpa [#allocation4], 1 }

</bundles_post_ra>
